<compile_context>
chip_gen: v5e
topology: v5e:2x2
jax: 0.10.0
libtpu: 0.0.40
codegen_flags: <defaults>
</compile_context>

<pallas_src>
from functools import partial

import jax
import jax.numpy as jnp
from jax.experimental import pallas as pl
from jax.experimental.pallas import tpu as pltpu


def _cdiv(a, b):
    return -(-a // b)


def _round_up(x, m):
    return ((x + m - 1) // m) * m


def _vmem_limit_bytes():
    """Per-generation scoped-VMEM limit (leave headroom under physical)."""
    try:
        phys = pltpu.get_tpu_info().vmem_capacity_bytes
    except Exception:
        phys = 64 * 1024 * 1024            # conservative fallback (v7x per-TC)
    if phys >= 100 * 1024 * 1024:          # v5e / v6e: 128 MiB physical
        return 96 * 1024 * 1024
    return 48 * 1024 * 1024                # v7x: 64 MiB physical per TC


# ----------------------- fully fused small-tensor path ---------------------- #
def _fused_kernel(x_ref, g_ref, b_ref, y_ref, *, count, eps):
    x = x_ref[...].astype(jnp.float32)                          # (N, C, S)
    s = jnp.sum(jnp.sum(x, axis=2, keepdims=True), axis=0, keepdims=True)
    q = jnp.sum(jnp.sum(x * x, axis=2, keepdims=True), axis=0, keepdims=True)
    inv_cnt = 1.0 / count
    mean = s * inv_cnt                                          # (1, C, 1)
    var = jnp.maximum(q * inv_cnt - mean * mean, 0.0)           # guard cancellation
    inv_std = jax.lax.rsqrt(var + eps)
    scale = g_ref[...] * inv_std                                # (1, C, 1)
    shift = b_ref[...] - mean * scale
    y = jnp.clip(x * scale + shift, 0.0, 6.0)                   # ReLU6
    y_ref[...] = y.astype(y_ref.dtype)


def _bn_relu6_fused(x3d, gamma, beta, eps, vmem_limit):
    N, C, S = x3d.shape
    g3 = gamma.astype(jnp.float32).reshape(1, C, 1)
    b3 = beta.astype(jnp.float32).reshape(1, C, 1)
    kern = partial(_fused_kernel, count=float(N * S), eps=float(eps))
    return pl.pallas_call(
        kern,
        out_shape=jax.ShapeDtypeStruct((N, C, S), x3d.dtype),
        in_specs=[pl.BlockSpec(memory_space=pltpu.MemorySpace.VMEM)] * 3,
        out_specs=pl.BlockSpec(memory_space=pltpu.MemorySpace.VMEM),
        compiler_params=pltpu.CompilerParams(vmem_limit_bytes=vmem_limit),
        cost_estimate=pl.CostEstimate(
            flops=8 * N * C * S, transcendentals=C,
            bytes_accessed=2 * N * C * S * x3d.dtype.itemsize),
    )(x3d, g3, b3)


# --------------------------- pass 1: statistics ----------------------------- #
def _stats_kernel(x_ref, sum_ref, sq_ref, *, R, S, TR, TS, lanes,
                  mask_rows, mask_cols):
    s_idx = pl.program_id(1)

    @pl.when(s_idx == 0)
    def _():
        sum_ref[...] = jnp.zeros_like(sum_ref)
        sq_ref[...] = jnp.zeros_like(sq_ref)

    x = x_ref[...].astype(jnp.float32)

    def accumulate(v):
        if lanes == 1:
            sum_ref[...] += jnp.sum(v, axis=1, keepdims=True)
            sq_ref[...] += jnp.sum(v * v, axis=1, keepdims=True)
        else:
            # Lane-dense accumulation: lane-aligned static slices + VPU adds,
            # no per-step cross-lane reduce, full (TR, 128) unmasked stores.
            a = v[:, :lanes]
            q = a * a
            for k in range(1, TS // lanes):
                c = v[:, k * lanes:(k + 1) * lanes]
                a = a + c
                q = q + c * c
            sum_ref[...] += a
            sq_ref[...] += q

    if mask_rows or mask_cols:
        r_idx = pl.program_id(0)
        edge = []
        if mask_rows:
            edge.append(r_idx == pl.num_programs(0) - 1)
        if mask_cols:
            edge.append(s_idx == pl.num_programs(1) - 1)
        is_edge = edge[0]
        for e in edge[1:]:
            is_edge = jnp.logical_or(is_edge, e)

        @pl.when(is_edge)                 # pay the mask only on edge tiles
        def _():
            valid = None
            if mask_rows:
                rows = (jax.lax.broadcasted_iota(jnp.int32, (TR, TS), 0)
                        + r_idx * TR)
                valid = rows < R
            if mask_cols:
                cols = (jax.lax.broadcasted_iota(jnp.int32, (TR, TS), 1)
                        + s_idx * TS)
                cv = cols < S
                valid = cv if valid is None else jnp.logical_and(valid, cv)
            accumulate(jnp.where(valid, x, 0.0))

        @pl.when(jnp.logical_not(is_edge))
        def _():
            accumulate(x)
    else:
        accumulate(x)


# ------------------------ pass 2: normalize + ReLU6 ------------------------- #
def _apply_kernel(x_ref, scale_ref, shift_ref, y_ref):
    x = x_ref[...].astype(jnp.float32)
    y = jnp.clip(x * scale_ref[...] + shift_ref[...], 0.0, 6.0)   # ReLU6
    y_ref[...] = y.astype(y_ref.dtype)


def _bn_relu6_tiled(x2d, gamma, beta, N, C, eps, block_rows, block_cols,
                    vmem_limit):
    R, S = x2d.shape
    itemsize = x2d.dtype.itemsize
    row_mult = max(8, 32 // itemsize)    # sublane packing: f32->8, bf16->16, i8->32

    # Row tile: multiple of row_mult (or the full dim), capped so the
    # "parallel" row axis has >= 2 tiles (keeps both v7x TensorCores busy).
    if R <= row_mult:
        TR = R
    else:
        cap = _round_up(_cdiv(R, 2), row_mult)
        TR = min(block_rows, cap)
        TR = max(row_mult, (TR // row_mult) * row_mult)

    # Column tile: multiple of 128, or the full dim when it already fits.
    if S <= block_cols:
        TS = S
    else:
        TS = max(128, (block_cols // 128) * 128)

    grid = (_cdiv(R, TR), _cdiv(S, TS))
    mask_rows = (R % TR) != 0
    mask_cols = (S % TS) != 0
    lanes = 128 if (TS % 128 == 0) else 1

    # ---- pass 1: per-row sum / sum-of-squares (reduction axis LAST) --------
    stats_kernel = partial(_stats_kernel, R=R, S=S, TR=TR, TS=TS, lanes=lanes,
                           mask_rows=mask_rows, mask_cols=mask_cols)
    row_sum, row_sq = pl.pallas_call(
        stats_kernel,
        out_shape=(jax.ShapeDtypeStruct((R, lanes), jnp.float32),
                   jax.ShapeDtypeStruct((R, lanes), jnp.float32)),
        grid=grid,
        in_specs=[pl.BlockSpec((TR, TS), lambda r, s: (r, s))],
        out_specs=(pl.BlockSpec((TR, lanes), lambda r, s: (r, 0)),
                   pl.BlockSpec((TR, lanes), lambda r, s: (r, 0))),
        compiler_params=pltpu.CompilerParams(
            dimension_semantics=("parallel", "arbitrary"),
            vmem_limit_bytes=vmem_limit),
        cost_estimate=pl.CostEstimate(
            flops=3 * R * S, transcendentals=0,
            bytes_accessed=R * S * itemsize + 8 * R * lanes),
    )(x2d)

    # ---- tiny XLA glue (C and N*C sized only): sums -> per-row scale/shift --
    cnt = jnp.float32(N * S)
    ch_sum = row_sum.reshape(N, C, lanes).sum(axis=(0, 2))
    ch_sq = row_sq.reshape(N, C, lanes).sum(axis=(0, 2))
    mean = ch_sum / cnt
    var = jnp.maximum(ch_sq / cnt - mean * mean, 0.0)   # guard cancellation
    inv_std = jax.lax.rsqrt(var + eps)
    scale_c = gamma.astype(jnp.float32) * inv_std
    shift_c = beta.astype(jnp.float32) - mean * scale_c
    scale_r = jnp.tile(scale_c, N).reshape(R, 1)        # row n*C + c -> channel c
    shift_r = jnp.tile(shift_c, N).reshape(R, 1)

    # ---- pass 2: y = clip(x*scale + shift, 0, 6), fully parallel grid ------
    y2d = pl.pallas_call(
        _apply_kernel,
        out_shape=jax.ShapeDtypeStruct((R, S), x2d.dtype),
        grid=grid,
        in_specs=[pl.BlockSpec((TR, TS), lambda r, s: (r, s)),
                  pl.BlockSpec((TR, 1), lambda r, s: (r, 0)),
                  pl.BlockSpec((TR, 1), lambda r, s: (r, 0))],
        out_specs=pl.BlockSpec((TR, TS), lambda r, s: (r, s)),
        compiler_params=pltpu.CompilerParams(
            dimension_semantics=("parallel", "parallel"),
            vmem_limit_bytes=vmem_limit),
        cost_estimate=pl.CostEstimate(
            flops=4 * R * S, transcendentals=0,
            bytes_accessed=2 * R * S * itemsize),
    )(x2d, scale_r, shift_r)
    return y2d


# --------------------------------- wrapper ---------------------------------- #
def bn_relu6(x_nchw, gamma, beta, *, eps=1e-5, block_rows=1024,
             block_cols=2048, fused_max_bytes=8 * 1024 * 1024):
    """Training-mode BatchNorm2d(eps) + ReLU6.  NCHW in / NCHW out."""
    N, C, H, W = x_nchw.shape
    R, S = N * C, H * W
    vmem_limit = _vmem_limit_bytes()

    if R * S * 4 <= fused_max_bytes:
        # Small tensor: single launch, x stays VMEM-resident for both stats
        # and normalize -> one HBM read + one HBM write.
        y3d = _bn_relu6_fused(x_nchw.reshape(N, C, S), gamma, beta, eps,
                              vmem_limit)
        return y3d.reshape(N, C, H, W)

    # Large tensor: two tiled HBM passes (exact global batch statistics).
    y2d = _bn_relu6_tiled(x_nchw.reshape(R, S), gamma, beta, N, C, eps,
                          block_rows, block_cols, vmem_limit)
    return y2d.reshape(N, C, H, W)


# -------------------------------- reference --------------------------------- #
def _reference(x, gamma, beta, eps=1e-5):
    mean = jnp.mean(x, axis=(0, 2, 3), keepdims=True)
    var = jnp.mean((x - mean) ** 2, axis=(0, 2, 3), keepdims=True)
    y = (x - mean) * jax.lax.rsqrt(var + eps)
    y = y * gamma.reshape(1, -1, 1, 1) + beta.reshape(1, -1, 1, 1)
    return jnp.clip(y, 0.0, 6.0)


if __name__ == "__main__":
    key = jax.random.PRNGKey(0)
    kx, kg, kb, kx2 = jax.random.split(key, 4)

    # BNRELU(nIn=4) on a (2, 4, 16, 16) input -> fully fused fast path.
    N, C, H, W = 2, 4, 16, 16
    x = jax.random.normal(kx, (N, C, H, W), dtype=jnp.float32)
    # BatchNorm2d default init is gamma=1, beta=0; perturb to exercise affine.
    gamma = 1.0 + 0.1 * jax.random.normal(kg, (C,), dtype=jnp.float32)
    beta = 0.1 * jax.random.normal(kb, (C,), dtype=jnp.float32)

    out = jax.block_until_ready(bn_relu6(x, gamma, beta, eps=1e-5))
    ref = _reference(x, gamma, beta, eps=1e-5)
    assert out.shape == ref.shape == (N, C, H, W)
    assert jnp.allclose(out, ref, rtol=1e-3, atol=1e-3)

    # Same input forced through the tiled two-pass path (multi-step reduction).
    out2 = jax.block_until_ready(
        bn_relu6(x, gamma, beta, eps=1e-5, block_cols=128, fused_max_bytes=0))
    assert jnp.allclose(out2, ref, rtol=1e-3, atol=1e-3)

    # Non-divisible shape: exercises the pad-free edge masking
    # (both a partial row tile and a partial column tile).
    N2, C2, H2, W2 = 3, 5, 10, 13
    x2 = jax.random.normal(kx2, (N2, C2, H2, W2), dtype=jnp.float32)
    g2 = 1.0 + 0.1 * jax.random.normal(kg, (C2,), dtype=jnp.float32)
    b2 = 0.1 * jax.random.normal(kb, (C2,), dtype=jnp.float32)
    out3 = jax.block_until_ready(
        bn_relu6(x2, g2, b2, eps=1e-5, block_rows=8, block_cols=128,
                 fused_max_bytes=0))
    ref3 = _reference(x2, g2, b2, eps=1e-5)
    assert jnp.allclose(out3, ref3, rtol=1e-3, atol=1e-3)

    print("KERNEL_OK")
</pallas_src>

<mosaic_0001>
module attributes {stable_mosaic.version = 11 : i64} {
  func.func @_fused_kernel(%arg0: memref<2x4x256xf32, #tpu.memory_space<vmem>>, %arg1: memref<1x4x1xf32, #tpu.memory_space<vmem>>, %arg2: memref<1x4x1xf32, #tpu.memory_space<vmem>>, %arg3: memref<2x4x256xf32, #tpu.memory_space<vmem>>) attributes {dimension_semantics = [], scalar_prefetch = 0 : i64, scratch_operands = 0 : i64, tpu.core_type = #tpu.core_type<tc>} {
    %c0 = arith.constant 0 : index
    %c0_0 = arith.constant 0 : index
    %c0_1 = arith.constant 0 : index
    %0 = vector.load %arg0[%c0, %c0_0, %c0_1] : memref<2x4x256xf32, #tpu.memory_space<vmem>>, vector<2x4x256xf32>
    %cst = arith.constant dense<0.000000e+00> : vector<2x4xf32>
    %1 = vector.multi_reduction <add>, %0, %cst [2] : vector<2x4x256xf32> to vector<2x4xf32>
    %2 = vector.shape_cast %1 : vector<2x4xf32> to vector<2x4x1xf32>
    %cst_2 = arith.constant dense<0.000000e+00> : vector<4x1xf32>
    %3 = vector.multi_reduction <add>, %2, %cst_2 [0] : vector<2x4x1xf32> to vector<4x1xf32>
    %4 = vector.shape_cast %3 : vector<4x1xf32> to vector<1x4x1xf32>
    %5 = arith.mulf %0, %0 : vector<2x4x256xf32>
    %cst_3 = arith.constant dense<0.000000e+00> : vector<2x4xf32>
    %6 = vector.multi_reduction <add>, %5, %cst_3 [2] : vector<2x4x256xf32> to vector<2x4xf32>
    %7 = vector.shape_cast %6 : vector<2x4xf32> to vector<2x4x1xf32>
    %cst_4 = arith.constant dense<0.000000e+00> : vector<4x1xf32>
    %8 = vector.multi_reduction <add>, %7, %cst_4 [0] : vector<2x4x1xf32> to vector<4x1xf32>
    %9 = vector.shape_cast %8 : vector<4x1xf32> to vector<1x4x1xf32>
    %cst_5 = arith.constant 0.001953125 : f32
    %10 = vector.broadcast %cst_5 : f32 to vector<1x4x1xf32>
    %11 = arith.mulf %4, %10 : vector<1x4x1xf32>
    %cst_6 = arith.constant 0.001953125 : f32
    %12 = vector.broadcast %cst_6 : f32 to vector<1x4x1xf32>
    %13 = arith.mulf %9, %12 : vector<1x4x1xf32>
    %14 = arith.mulf %11, %11 : vector<1x4x1xf32>
    %15 = arith.subf %13, %14 : vector<1x4x1xf32>
    %cst_7 = arith.constant 0.000000e+00 : f32
    %16 = vector.broadcast %cst_7 : f32 to vector<1x4x1xf32>
    %17 = arith.maximumf %15, %16 : vector<1x4x1xf32>
    %cst_8 = arith.constant 9.99999974E-6 : f32
    %18 = vector.broadcast %cst_8 : f32 to vector<1x4x1xf32>
    %19 = arith.addf %17, %18 : vector<1x4x1xf32>
    %20 = math.rsqrt %19 : vector<1x4x1xf32>
    %c0_9 = arith.constant 0 : index
    %c0_10 = arith.constant 0 : index
    %c0_11 = arith.constant 0 : index
    %21 = vector.load %arg1[%c0_9, %c0_10, %c0_11] : memref<1x4x1xf32, #tpu.memory_space<vmem>>, vector<1x4x1xf32>
    %22 = arith.mulf %21, %20 : vector<1x4x1xf32>
    %c0_12 = arith.constant 0 : index
    %c0_13 = arith.constant 0 : index
    %c0_14 = arith.constant 0 : index
    %23 = vector.load %arg2[%c0_12, %c0_13, %c0_14] : memref<1x4x1xf32, #tpu.memory_space<vmem>>, vector<1x4x1xf32>
    %24 = arith.mulf %11, %22 : vector<1x4x1xf32>
    %25 = arith.subf %23, %24 : vector<1x4x1xf32>
    %26 = vector.broadcast %22 : vector<1x4x1xf32> to vector<2x4x256xf32>
    %27 = arith.mulf %0, %26 : vector<2x4x256xf32>
    %28 = vector.broadcast %25 : vector<1x4x1xf32> to vector<2x4x256xf32>
    %29 = arith.addf %27, %28 : vector<2x4x256xf32>
    %cst_15 = arith.constant 0.000000e+00 : f32
    %cst_16 = arith.constant 6.000000e+00 : f32
    %30 = vector.broadcast %cst_15 : f32 to vector<2x4x256xf32>
    %31 = arith.maximumf %30, %29 : vector<2x4x256xf32>
    %32 = vector.broadcast %cst_16 : f32 to vector<2x4x256xf32>
    %33 = arith.minimumf %32, %31 : vector<2x4x256xf32>
    %c0_17 = arith.constant 0 : index
    %c0_18 = arith.constant 0 : index
    %c0_19 = arith.constant 0 : index
    %34 = vector.load %arg3[%c0_17, %c0_18, %c0_19] : memref<2x4x256xf32, #tpu.memory_space<vmem>>, vector<2x4x256xf32>
    tpu.vector_store %arg3[%c0_17, %c0_18, %c0_19], %33 {strides = array<i32>} : memref<2x4x256xf32, #tpu.memory_space<vmem>>, vector<2x4x256xf32>,
    return
  }
}

</mosaic_0001>

<bundles_post_ra>
// kernel: tpu_custom_call.1
= control target key start
LH: loop header
LB: loop body
LE: loop exit
PB: predicated region body
PF: predicated region fallthrough
CT: control target
= control target key end

     0   :  { %8 = vsyncpa [#allocation3], 0  ;;  %s286_s0 = inlined_call_operand.hbm [shape: f32[2,4,256], index: 0, kind: input, shape index: {}]   ;;  %s287_s1 = inlined_call_operand.vmem [shape: f32[1,4,1], index: 1, kind: input, shape index: {}]   ;;  %s288_s2 = inlined_call_operand.vmem [shape: f32[1,4,1], index: 2, kind: input, shape index: {}]   ;;  %s289_s3 = inlined_call_operand.hbm [shape: f32[2,4,256], index: 3, kind: output, shape index: {}]  }
   0x1   :  { %9 = vsyncpa [#allocation4], 0  ;;  %s14_s14 = sshll.u32 %s286_s0, 4  ;;  %s218_s15 = smov [#allocation2]   ;;  %s15_s14 = int_to_ptr.hbm [resolvable:$true] %s14_s14 }
   0x2   :  { %s16_s16 = sshll.u32 %s218_s15, 4  ;;  %s219_s17 = smov 128   ;;  %s17_s16 = int_to_ptr.vmem [resolvable:$true] %s16_s16 }
   0x3   :  { %s220_s18 = smov 8  }
   0x4   :  { %22 = dma.hbm_to_vmem [thread:$0]  %s15_s14, 256, %s17_s16, [#allocation3], %s219_s17, %s219_s17, %s220_s18  }
   0x5   :  { %214 = dma.done.wait [#allocation3], 256  }
   0x6   :  { %215 = vsyncadd [#allocation3], 4294967040  ;;  %v250_v0 = vld [vmem:[#allocation2] sm:$0xff]  ;;  %v252_v1 = vld [vmem:[#allocation2 + $0x8] sm:$0xff]  ;;  %vm46_vm0 = vcmask 1043456   ;;  %v221_v25 = vmov 0  }
   0x7   :  { %35 = vst [vmem:[#allocation1] ss:$2 sm:$0xff] %v250_v0  ;;  %v60_v2 = vmul.f32 %v250_v0, %v250_v0  ;;  %v61_v3 = vmul.f32 %v252_v1, %v252_v1  ;;  %162 = vset.pattern.permute.xlu2 %v221_v25  ;;  %163 = vset.pattern.permute.xlu0 %v221_v25  ;;  %v104_v47 = vld [vmem:[%s287_s1] sm:$0xf]  ;;  %v222_v53 = vmov 839922192  }
   0x8   :  { %39 = vst [vmem:[#allocation1 + $0x10] ss:$2 sm:$0xff] %v252_v1  ;;  %v106_v51 = vld [vmem:[%s288_s2] sm:$0xf]  ;;  %v114_v54 = vunpack.c.l.s4 %v222_v53  ;;  %s223_s1 = smov [#allocation5]   ;;  %s143_s24 = sshll.u32 %s289_s3, 4  ;;  %s144_s24 = int_to_ptr.hbm [resolvable:$true] %s143_s24 }
   0x9   :  { %s141_s22 = sshll.u32 %s223_s1, 4  ;;  %s142_s22 = int_to_ptr.vmem [resolvable:$true] %s141_s22 }
   0xa   :  { %v115_v56 = vunpack.c.0.s8 %v114_v54 }
   0xe   :  { %v36_v4 = vld.sshfl [vmem:[#allocation1] sm:$0xff pattern:$0x75316420]  ;;  %v37_v5 = vld.sshfl [vmem:[#allocation1 + $0x8] sm:$0xff pattern:$0x75316420] }
   0xf   :  { %v47_v6 = vsel %vm46_vm0, %v36_v4, 0.0  ;;  %v48_v7 = vsel %vm46_vm0, %v37_v5, 0.0  ;;  %64 = vst [vmem:[#allocation1] ss:$2 sm:$0xff] %v60_v2 }
  0x10   :  { %v49_v8 = vadd.f32 %v48_v7, %v47_v6  ;;  %v40_v9 = vld.sshfl [vmem:[#allocation1 + $0x10] sm:$0xff pattern:$0x75316420]  ;;  %v41_v10 = vld.sshfl [vmem:[#allocation1 + $0x18] sm:$0xff pattern:$0x75316420] }
  0x11   :  { %68 = vst [vmem:[#allocation1 + $0x10] ss:$2 sm:$0xff] %v61_v3  ;;  %v52_v11 = vsel %vm46_vm0, %v40_v9, 0.0  ;;  %v53_v12 = vsel %vm46_vm0, %v41_v10, 0.0 }
  0x12   :  { %50 = vadd.xlane.f32.xlu0 %v49_v8  ;;  %v54_v15 = vadd.f32 %v53_v12, %v52_v11 }
  0x16   :  { %v65_v13 = vld.sshfl [vmem:[#allocation1] sm:$0xff pattern:$0x75316420]  ;;  %v66_v14 = vld.sshfl [vmem:[#allocation1 + $0x8] sm:$0xff pattern:$0x75316420] }
  0x17   :  { %v75_v16 = vsel %vm46_vm0, %v65_v13, 0.0  ;;  %v76_v17 = vsel %vm46_vm0, %v66_v14, 0.0 }
  0x18   :  { %v77_v18 = vadd.f32 %v76_v17, %v75_v16  ;;  %v69_v19 = vld.sshfl [vmem:[#allocation1 + $0x10] sm:$0xff pattern:$0x75316420]  ;;  %v70_v20 = vld.sshfl [vmem:[#allocation1 + $0x18] sm:$0xff pattern:$0x75316420] }
  0x19   :  { %v80_v21 = vsel %vm46_vm0, %v69_v19, 0.0  ;;  %v81_v22 = vsel %vm46_vm0, %v70_v20, 0.0 }
  0x1a   :  { %78 = vadd.xlane.f32.xlu1 %v77_v18  ;;  %55 = vadd.xlane.f32.xlu0 %v54_v15  ;;  %v82_v23 = vadd.f32 %v81_v22, %v80_v21 }
  0x22   :  { %83 = vadd.xlane.f32.xlu1 %v82_v23 }
  0x85   :  { %v51_v24 = vpop.xlane.xlu0 %50 }
  0x86   :  { %v57_v29 = vsel %vm46_vm0, %v51_v24, 0.0 }
  0x8d   :  { %v79_v26 = vpop.xlane.xlu1 %78  ;;  %v56_v27 = vpop.xlane.xlu0 %55 }
  0x8e   :  { %v58_v28 = vsel %vm46_vm0, %v56_v27, 0.0  ;;  %v85_v33 = vsel %vm46_vm0, %v79_v26, 0.0 }
  0x8f   :  { %v59_v30 = vadd.f32 %v58_v28, %v57_v29 }
  0x91   :  { %v88_v31 = vmul.f32 0.001953125, %v59_v30 }
  0x93   :  { %v90_v36 = vmul.f32 %v88_v31, %v88_v31 }
  0x95   :  { %v84_v32 = vpop.xlane.xlu1 %83 }
  0x96   :  { %v86_v34 = vsel %vm46_vm0, %v84_v32, 0.0 }
  0x97   :  { %v87_v35 = vadd.f32 %v86_v34, %v85_v33 }
  0x99   :  { %v89_v37 = vmul.f32 0.001953125, %v87_v35 }
  0x9b   :  { %v91_v38 = vsub.f32 %v89_v37, %v90_v36 }
  0x9d   :  { %v92_v39 = vmax.f32 %v91_v38, 0.0 }
  0x9f   :  { %v93_v40 = vadd.f32 1e-05, %v92_v39 }
  0xa1   :  { %164 = vrsqrt.f32 %v93_v40  ;;  %vm100_vm2 = vweird.f32 %v93_v40 }
  0xa7   :  { %v165_v41 = vpop.eup %164 }
  0xa8   :  { %v95_v42 = vmul.f32 %v165_v41, %v93_v40  ;;  %vm101_vm1 = vweird.f32 %v165_v41 }
  0xa9   :  { %vm102_vm3 = vmor %vm100_vm2, %vm101_vm1 }
  0xaa   :  { %v96_v43 = vmul.f32 %v165_v41, %v95_v42 }
  0xac   :  { %v97_v44 = vmul.f32 0.5, %v96_v43 }
  0xae   :  { %v98_v45 = vsub.f32 1.5, %v97_v44 }
  0xb0   :  { %v99_v46 = vmul.f32 %v165_v41, %v98_v45 }
  0xb2   :  { %v103_v48 = vsel %vm102_vm3, %v165_v41, %v99_v46 }
  0xb3   :  { %v105_v49 = vmul.f32 %v104_v47, %v103_v48 }
  0xb5   :  { %111 = vperm.xlu2 %162, %v105_v49   ;;  %v107_v50 = vmul.f32 %v105_v49, %v88_v31 }
  0xb7   :  { %v108_v52 = vsub.f32 %v106_v51, %v107_v50 }
  0xbd   :  { %122 = vperm.xlu2 %162, %v108_v52  }
 0x10f   :  { %v112_v55 = vpop.permute.xlu2 %111 }
 0x110   :  { %v116_v57 = vperm.slane %v112_v55, %v115_v56 }
 0x112   :  { %v118_v59 = vmul.f32 %v116_v57, %v250_v0  ;;  %v119_v60 = vmul.f32 %v116_v57, %v252_v1 }
 0x117   :  { %v123_v58 = vpop.permute.xlu2 %122 }
 0x118   :  { %v127_v61 = vperm.slane %v123_v58, %v115_v56 }
 0x11a   :  { %v129_v62 = vadd.f32 %v127_v61, %v118_v59  ;;  %v130_v63 = vadd.f32 %v127_v61, %v119_v60 }
 0x11c   :  { %v131_v2 = vmax.f32 %v129_v62, 0.0  ;;  %v132_v3 = vmax.f32 %v130_v63, 0.0 }
 0x11e   :  { %v133_v4 = vmin.f32 %v131_v2, 6.0  ;;  %v134_v5 = vmin.f32 %v132_v3, 6.0 }
 0x120   :  { %135 = vst [vmem:[#allocation5] sm:$0xff] %v133_v4 }
 0x121   :  { %136 = vst [vmem:[#allocation5 + $0x8] sm:$0xff] %v134_v5 }
 0x122   :  { %149 = dma.vmem_to_hbm [thread:$0]  %s142_s22, 256, %s144_s24, [#allocation4], %s219_s17, %s219_s17, %s220_s18  }
 0x123   :  { %216 = dma.done.wait [#allocation4], 256  }
 0x124   :  { %217 = vsyncadd [#allocation4], 4294967040 }
 0x125   :  { %154 = vsyncpa [#allocation3], 1 }
 0x126   :  { %155 = vsyncpa [#allocation4], 1 }

</bundles_post_ra>
